<compile_context>
chip_gen: v7x
topology: tpu7x:2x2x1
jax: 0.10.0
libtpu: 0.0.40
codegen_flags: <defaults>
</compile_context>

<pallas_src>
import functools
import math

import jax
import jax.numpy as jnp
from jax import lax
from jax.experimental import pallas as pl
from jax.experimental.pallas import tpu as pltpu


# --------------------------------------------------------------------------
# Pass 1: per-(batch, head) Q/K/V projection.
# --------------------------------------------------------------------------
def _qkv_proj_kernel(x_ref, wq_ref, bq_ref, wk_ref, bk_ref, wv_ref, bv_ref,
                     q_ref, k_ref, v_ref):
    # x_ref: (S, d_model); w*_ref: (d_model, dq/dv); b*_ref: (1, dq/dv) f32.
    x = x_ref[...]
    q = jnp.dot(x, wq_ref[...], preferred_element_type=jnp.float32) + bq_ref[...]
    k = jnp.dot(x, wk_ref[...], preferred_element_type=jnp.float32) + bk_ref[...]
    v = jnp.dot(x, wv_ref[...], preferred_element_type=jnp.float32) + bv_ref[...]
    q_ref[...] = q.astype(q_ref.dtype)
    k_ref[...] = k.astype(k_ref.dtype)
    v_ref[...] = v.astype(v_ref.dtype)


# --------------------------------------------------------------------------
# Pass 2: attention + output projection for one (batch, query-tile) step.
# --------------------------------------------------------------------------
def _attention_kernel(q_ref, k_ref, v_ref, wo_ref, bo_ref, out_ref, score_ref,
                      *, apply_mask, approx_recip):
    # q_ref: (h, tq, dq); k_ref: (h, S, dq); v_ref: (h, S, dv)
    # wo_ref: (h, dv, d_model); bo_ref: (1, d_model)
    # out_ref: (tq, d_model) f32; score_ref: (h, tq, S)
    h, tq, _ = q_ref.shape
    S = k_ref.shape[1]
    d_model = out_ref.shape[-1]

    if apply_mask:
        q0 = pl.program_id(1) * tq                      # global query-row offset of this tile
        row = lax.broadcasted_iota(jnp.int32, (tq, S), 0) + q0
        col = lax.broadcasted_iota(jnp.int32, (tq, S), 1)
        keep = col <= row
        neg_fill = jnp.float32(-2.0 ** 32 + 1)

    def head_step(hd, acc):
        q_h = q_ref[hd]                                 # (tq, dq) — leading-axis slice, free
        k_h = k_ref[hd]                                 # (S,  dq)
        v_h = v_ref[hd]                                 # (S,  dv)
        # NT matmul (contract last dims of both) -> no K transpose.  1/sqrt(q) is folded
        # into W_q, so `raw` is exactly the PyTorch self.score (pre-mask, pre-softmax).
        raw = lax.dot_general(q_h, k_h, (((1,), (1,)), ((), ())),
                              preferred_element_type=jnp.float32)       # (tq, S) f32
        score_ref[hd] = raw.astype(score_ref.dtype)

        s = jnp.where(keep, raw, neg_fill) if apply_mask else raw
        m = jnp.max(s, axis=-1, keepdims=True)
        e = jnp.exp(s - m)
        l = jnp.sum(e, axis=-1, keepdims=True)
        p = e * pl.reciprocal(l, approx=approx_recip)   # EUP slot when approx=True

        pv = jnp.dot(p.astype(v_h.dtype), v_h,
                     preferred_element_type=jnp.float32)                # (tq, dv)
        # Per-head fold into the output projection (no head concat, no lane shuffles).
        return acc + jnp.dot(pv.astype(wo_ref.dtype), wo_ref[hd],
                             preferred_element_type=jnp.float32)        # (tq, d_model)

    acc = lax.fori_loop(0, h, head_step, jnp.zeros((tq, d_model), jnp.float32))
    out_ref[...] = acc + bo_ref[...]


# --------------------------------------------------------------------------
# VMEM sizing helper: double-buffered block footprint + margin, capped for v7x.
# --------------------------------------------------------------------------
def _vmem_limit_bytes(blocks):
    total = 0
    for shape, dtype in blocks:
        n = 1
        for d in shape:
            n *= int(d)
        total += n * jnp.dtype(dtype).itemsize
    return int(min(max(2 * total + (4 << 20), 16 << 20), 64 << 20))


# --------------------------------------------------------------------------
# Wrapper
# --------------------------------------------------------------------------
def multi_head_attention(x, params, *, h, q_dim, v_dim, mask=False, stage="test",
                         matmul_dtype=jnp.bfloat16, score_dtype=jnp.float32,
                         q_tile=256):
    """Pallas TPU forward of the PyTorch MultiHeadAttention module.

    Returns (self_attention (B,S,d_model) f32, raw_score (h*B,S,S) score_dtype).

    `params` are PyTorch nn.Linear-style weights:
      Wq_w (q*h,d_model), Wq_b (q*h,), Wk_w, Wk_b, Wv_w (v*h,d_model), Wv_b,
      Wo_w (d_model, v*h), Wo_b (d_model,).

    matmul_dtype=bf16 (default) is the recommended perf path; raw scores then
    match the f32 PyTorch module only to ~1e-2.  Pass matmul_dtype=jnp.float32
    (and score_dtype=f32) for exact parity.  Dropout is declared but never
    applied in the PyTorch forward, so it is not applied here.
    """
    B, S, d_model = x.shape
    Wq_w, Wq_b, Wk_w, Wk_b, Wv_w, Wv_b, Wo_w, Wo_b = params
    apply_mask = bool(mask) and (stage == "train")
    approx_recip = (jnp.dtype(matmul_dtype) != jnp.dtype(jnp.float32))

    tq = S if S <= q_tile else q_tile
    assert S % tq == 0, "TODO(synk): pad S up to a multiple of the query tile"
    # TODO(synk): for peak v5e store bandwidth, S should be a multiple of 128 (pad if not).

    scale = 1.0 / math.sqrt(q_dim)
    # Head-major weight layout (host-side, one-time): every in-kernel per-head access
    # becomes a leading-axis slice -> no 128-lane misalignment.  Scale folded into W_q/b_q.
    wq = (Wq_w * scale).reshape(h, q_dim, d_model).transpose(0, 2, 1).astype(matmul_dtype)
    wk = Wk_w.reshape(h, q_dim, d_model).transpose(0, 2, 1).astype(matmul_dtype)
    wv = Wv_w.reshape(h, v_dim, d_model).transpose(0, 2, 1).astype(matmul_dtype)
    bq = (Wq_b * scale).reshape(h, 1, q_dim).astype(jnp.float32)
    bk = Wk_b.reshape(h, 1, q_dim).astype(jnp.float32)
    bv = Wv_b.reshape(h, 1, v_dim).astype(jnp.float32)
    wo = Wo_w.T.reshape(h, v_dim, d_model).astype(matmul_dtype)          # (h, dv, d_model)
    bo = Wo_b.reshape(1, d_model).astype(jnp.float32)
    x_c = x.astype(matmul_dtype)                                          # host pre-cast

    # ---------------- Pass 1: Q/K/V projection, grid (B, h), fully parallel ----------------
    # TODO(synk): for very long S, additionally tile the S axis of x in pass 1.
    vmem1 = _vmem_limit_bytes([
        ((S, d_model), matmul_dtype),
        ((d_model, q_dim), matmul_dtype), ((1, q_dim), jnp.float32),
        ((d_model, q_dim), matmul_dtype), ((1, q_dim), jnp.float32),
        ((d_model, v_dim), matmul_dtype), ((1, v_dim), jnp.float32),
        ((S, q_dim), matmul_dtype), ((S, q_dim), matmul_dtype), ((S, v_dim), matmul_dtype),
    ])
    qkv_spec = pltpu.PrefetchScalarGridSpec(
        num_scalar_prefetch=0,
        grid=(B, h),
        in_specs=[
            pl.BlockSpec((None, S, d_model), lambda b, hd: (b, 0, 0)),       # x (per batch)
            pl.BlockSpec((None, d_model, q_dim), lambda b, hd: (hd, 0, 0)),  # W_q[h]
            pl.BlockSpec((None, 1, q_dim), lambda b, hd: (hd, 0, 0)),        # b_q[h]
            pl.BlockSpec((None, d_model, q_dim), lambda b, hd: (hd, 0, 0)),  # W_k[h]
            pl.BlockSpec((None, 1, q_dim), lambda b, hd: (hd, 0, 0)),        # b_k[h]
            pl.BlockSpec((None, d_model, v_dim), lambda b, hd: (hd, 0, 0)),  # W_v[h]
            pl.BlockSpec((None, 1, v_dim), lambda b, hd: (hd, 0, 0)),        # b_v[h]
        ],
        out_specs=[
            pl.BlockSpec((None, None, S, q_dim), lambda b, hd: (b, hd, 0, 0)),
            pl.BlockSpec((None, None, S, q_dim), lambda b, hd: (b, hd, 0, 0)),
            pl.BlockSpec((None, None, S, v_dim), lambda b, hd: (b, hd, 0, 0)),
        ],
    )
    q_all, k_all, v_all = pl.pallas_call(
        _qkv_proj_kernel,
        out_shape=(jax.ShapeDtypeStruct((B, h, S, q_dim), matmul_dtype),
                   jax.ShapeDtypeStruct((B, h, S, q_dim), matmul_dtype),
                   jax.ShapeDtypeStruct((B, h, S, v_dim), matmul_dtype)),
        grid_spec=qkv_spec,
        compiler_params=pltpu.CompilerParams(
            dimension_semantics=("parallel", "parallel"),
            vmem_limit_bytes=vmem1),
    )(x_c, wq, bq, wk, bk, wv, bv)

    # --------- Pass 2: attention + output projection, grid (B, S//tq), fully parallel ---------
    vmem2 = _vmem_limit_bytes([
        ((h, tq, q_dim), matmul_dtype),
        ((h, S, q_dim), matmul_dtype),
        ((h, S, v_dim), matmul_dtype),
        ((h, v_dim, d_model), matmul_dtype),
        ((1, d_model), jnp.float32),
        ((tq, d_model), jnp.float32),
        ((h, tq, S), score_dtype),
    ])
    attn_spec = pltpu.PrefetchScalarGridSpec(
        num_scalar_prefetch=0,
        grid=(B, S // tq),
        in_specs=[
            pl.BlockSpec((None, h, tq, q_dim), lambda b, qt: (b, 0, qt, 0)),  # Q tile
            pl.BlockSpec((None, h, S, q_dim), lambda b, qt: (b, 0, 0, 0)),    # K (re-DMA'd only per batch)
            pl.BlockSpec((None, h, S, v_dim), lambda b, qt: (b, 0, 0, 0)),    # V
            # TODO(synk): pipeline_mode=pl.Buffered(1) for the constant weight blocks on v7x.
            pl.BlockSpec((h, v_dim, d_model), lambda b, qt: (0, 0, 0)),       # W_o (resident)
            pl.BlockSpec((1, d_model), lambda b, qt: (0, 0)),                 # b_o
        ],
        out_specs=[
            pl.BlockSpec((None, tq, d_model), lambda b, qt: (b, qt, 0)),      # self_attention
            pl.BlockSpec((h, None, tq, S), lambda b, qt: (0, b, qt, 0)),      # raw scores (h,B,S,S)
        ],
    )
    # TODO(synk): add a return_score=False mode that skips the score output entirely
    # (it is the dominant HBM writeback for large S).
    kernel = functools.partial(_attention_kernel, apply_mask=apply_mask,
                               approx_recip=approx_recip)
    out, score4 = pl.pallas_call(
        kernel,
        out_shape=(jax.ShapeDtypeStruct((B, S, d_model), jnp.float32),
                   jax.ShapeDtypeStruct((h, B, S, S), score_dtype)),
        grid_spec=attn_spec,
        compiler_params=pltpu.CompilerParams(
            dimension_semantics=("parallel", "parallel"),
            vmem_limit_bytes=vmem2),
    )(q_all, k_all, v_all, wo, bo)

    # (h, B, S, S) -> (h*B, S, S): row i*B + b == head i, batch b (PyTorch cat-of-chunks layout).
    return out, score4.reshape(h * B, S, S)


# --------------------------------------------------------------------------
# Parameter setup (PyTorch nn.Linear-style weights)
# --------------------------------------------------------------------------
def init_params(key, d_model, q_dim, v_dim, h):
    def linear(key, out_f, in_f):
        kw, kb = jax.random.split(key)
        bound = 1.0 / math.sqrt(in_f)
        w = jax.random.uniform(kw, (out_f, in_f), jnp.float32, -bound, bound)
        b = jax.random.uniform(kb, (out_f,), jnp.float32, -bound, bound)
        return w, b

    k1, k2, k3, k4 = jax.random.split(key, 4)
    Wq_w, Wq_b = linear(k1, q_dim * h, d_model)
    Wk_w, Wk_b = linear(k2, q_dim * h, d_model)
    Wv_w, Wv_b = linear(k3, v_dim * h, d_model)
    Wo_w, Wo_b = linear(k4, d_model, v_dim * h)
    return (Wq_w, Wq_b, Wk_w, Wk_b, Wv_w, Wv_b, Wo_w, Wo_b)


# --------------------------------------------------------------------------
# Pure-JAX reference replicating the PyTorch forward exactly (full f32 precision).
# --------------------------------------------------------------------------
def reference(x, params, *, h, q_dim, mask, stage):
    Wq_w, Wq_b, Wk_w, Wk_b, Wv_w, Wv_b, Wo_w, Wo_b = params
    P = jax.lax.Precision.HIGHEST

    def lin(a, w, b):
        return jnp.matmul(a, w.T, precision=P) + b

    Q = jnp.concatenate(jnp.split(lin(x, Wq_w, Wq_b), h, axis=-1), axis=0)
    K = jnp.concatenate(jnp.split(lin(x, Wk_w, Wk_b), h, axis=-1), axis=0)
    V = jnp.concatenate(jnp.split(lin(x, Wv_w, Wv_b), h, axis=-1), axis=0)
    score = jnp.matmul(Q, jnp.swapaxes(K, -1, -2), precision=P) / math.sqrt(q_dim)
    raw = score
    if mask and stage == "train":
        m = jnp.tril(jnp.ones_like(score[0]))
        score = jnp.where(m > 0, score, jnp.float32(-2.0 ** 32 + 1))
    score = jax.nn.softmax(score, axis=-1)
    attention = jnp.matmul(score, V, precision=P)
    heads = jnp.concatenate(jnp.split(attention, h, axis=0), axis=-1)
    out = lin(heads, Wo_w, Wo_b)
    return out, raw


if __name__ == "__main__":
    B, S, d_model = 2, 8, 32
    q_dim, v_dim, h = 16, 16, 4

    key = jax.random.PRNGKey(0)
    kx, kp = jax.random.split(key)
    x = jax.random.normal(kx, (B, S, d_model), jnp.float32)
    params = init_params(kp, d_model, q_dim, v_dim, h)

    # 1) f32 exact-parity path (mask=False, stage='test')
    out, score = multi_head_attention(x, params, h=h, q_dim=q_dim, v_dim=v_dim,
                                      mask=False, stage="test",
                                      matmul_dtype=jnp.float32)
    out, score = jax.block_until_ready((out, score))
    ref_out, ref_score = reference(x, params, h=h, q_dim=q_dim, mask=False, stage="test")
    assert out.shape == (B, S, d_model) and score.shape == (h * B, S, S)
    assert jnp.allclose(out, ref_out, atol=2e-4, rtol=2e-4), "f32 out mismatch"
    assert jnp.allclose(score, ref_score, atol=2e-4, rtol=2e-4), "f32 score mismatch"

    # 2) masked training config (causal mask applied, still f32-exact)
    out_m, score_m = multi_head_attention(x, params, h=h, q_dim=q_dim, v_dim=v_dim,
                                          mask=True, stage="train",
                                          matmul_dtype=jnp.float32)
    out_m, score_m = jax.block_until_ready((out_m, score_m))
    ref_out_m, ref_score_m = reference(x, params, h=h, q_dim=q_dim, mask=True, stage="train")
    assert jnp.allclose(out_m, ref_out_m, atol=2e-4, rtol=2e-4), "masked out mismatch"
    assert jnp.allclose(score_m, ref_score_m, atol=2e-4, rtol=2e-4), "masked score mismatch"

    # 3) recommended perf path: bf16 MXU inputs, approx softmax recip, bf16 raw scores.
    out_b, score_b = multi_head_attention(x, params, h=h, q_dim=q_dim, v_dim=v_dim,
                                          mask=False, stage="test",
                                          matmul_dtype=jnp.bfloat16,
                                          score_dtype=jnp.bfloat16)
    out_b, score_b = jax.block_until_ready((out_b, score_b))
    assert jnp.allclose(out_b, ref_out, atol=1e-1, rtol=1e-1), "bf16 out mismatch"
    assert jnp.allclose(score_b.astype(jnp.float32), ref_score,
                        atol=1e-1, rtol=1e-1), "bf16 score mismatch"

    print("KERNEL_OK")
</pallas_src>

<mosaic_0001>
module attributes {stable_mosaic.version = 11 : i64} {
  func.func @_qkv_proj_kernel(%arg0: i32, %arg1: i32, %arg2: memref<1x8x32xf32, #tpu.memory_space<vmem>>, %arg3: memref<1x32x16xf32, #tpu.memory_space<vmem>>, %arg4: memref<1x1x16xf32, #tpu.memory_space<vmem>>, %arg5: memref<1x32x16xf32, #tpu.memory_space<vmem>>, %arg6: memref<1x1x16xf32, #tpu.memory_space<vmem>>, %arg7: memref<1x32x16xf32, #tpu.memory_space<vmem>>, %arg8: memref<1x1x16xf32, #tpu.memory_space<vmem>>, %arg9: memref<1x1x8x16xf32, #tpu.memory_space<vmem>>, %arg10: memref<1x1x8x16xf32, #tpu.memory_space<vmem>>, %arg11: memref<1x1x8x16xf32, #tpu.memory_space<vmem>>) attributes {dimension_semantics = [#tpu.dimension_semantics<parallel>, #tpu.dimension_semantics<parallel>], iteration_bounds = array<i64: 2, 4>, scalar_prefetch = 0 : i64, scratch_operands = 0 : i64, tpu.core_type = #tpu.core_type<tc>, window_params = [{transform_indices = @transform_0, window_bounds = array<i64: 1, 8, 32>}, {transform_indices = @transform_1, window_bounds = array<i64: 1, 32, 16>}, {transform_indices = @transform_2, window_bounds = array<i64: 1, 1, 16>}, {transform_indices = @transform_3, window_bounds = array<i64: 1, 32, 16>}, {transform_indices = @transform_4, window_bounds = array<i64: 1, 1, 16>}, {transform_indices = @transform_5, window_bounds = array<i64: 1, 32, 16>}, {transform_indices = @transform_6, window_bounds = array<i64: 1, 1, 16>}, {transform_indices = @transform_7, window_bounds = array<i64: 1, 1, 8, 16>}, {transform_indices = @transform_8, window_bounds = array<i64: 1, 1, 8, 16>}, {transform_indices = @transform_9, window_bounds = array<i64: 1, 1, 8, 16>}]} {
    %c0 = arith.constant 0 : index
    %c0_0 = arith.constant 0 : index
    %c0_1 = arith.constant 0 : index
    %0 = vector.load %arg2[%c0, %c0_0, %c0_1] : memref<1x8x32xf32, #tpu.memory_space<vmem>>, vector<1x8x32xf32>
    %1 = vector.shape_cast %0 : vector<1x8x32xf32> to vector<8x32xf32>
    %c0_2 = arith.constant 0 : index
    %c0_3 = arith.constant 0 : index
    %c0_4 = arith.constant 0 : index
    %2 = vector.load %arg3[%c0_2, %c0_3, %c0_4] : memref<1x32x16xf32, #tpu.memory_space<vmem>>, vector<1x32x16xf32>
    %3 = vector.shape_cast %2 : vector<1x32x16xf32> to vector<32x16xf32>
    %cst = arith.constant dense<0.000000e+00> : vector<8x16xf32>
    %4 = tpu.matmul %1, %3, %cst {dimension_numbers = #tpu.dot_dimension_numbers<[1], [0], [0], [1], [0, 0, 1, 1], [], []>} : vector<8x32xf32>, vector<32x16xf32>, vector<8x16xf32> -> vector<8x16xf32>
    %c0_5 = arith.constant 0 : index
    %c0_6 = arith.constant 0 : index
    %c0_7 = arith.constant 0 : index
    %5 = vector.load %arg4[%c0_5, %c0_6, %c0_7] : memref<1x1x16xf32, #tpu.memory_space<vmem>>, vector<1x1x16xf32>
    %6 = vector.shape_cast %5 : vector<1x1x16xf32> to vector<1x16xf32>
    %7 = vector.broadcast %6 : vector<1x16xf32> to vector<8x16xf32>
    %8 = arith.addf %4, %7 : vector<8x16xf32>
    %c0_8 = arith.constant 0 : index
    %c0_9 = arith.constant 0 : index
    %c0_10 = arith.constant 0 : index
    %9 = vector.load %arg5[%c0_8, %c0_9, %c0_10] : memref<1x32x16xf32, #tpu.memory_space<vmem>>, vector<1x32x16xf32>
    %10 = vector.shape_cast %9 : vector<1x32x16xf32> to vector<32x16xf32>
    %cst_11 = arith.constant dense<0.000000e+00> : vector<8x16xf32>
    %11 = tpu.matmul %1, %10, %cst_11 {dimension_numbers = #tpu.dot_dimension_numbers<[1], [0], [0], [1], [0, 0, 1, 1], [], []>} : vector<8x32xf32>, vector<32x16xf32>, vector<8x16xf32> -> vector<8x16xf32>
    %c0_12 = arith.constant 0 : index
    %c0_13 = arith.constant 0 : index
    %c0_14 = arith.constant 0 : index
    %12 = vector.load %arg6[%c0_12, %c0_13, %c0_14] : memref<1x1x16xf32, #tpu.memory_space<vmem>>, vector<1x1x16xf32>
    %13 = vector.shape_cast %12 : vector<1x1x16xf32> to vector<1x16xf32>
    %14 = vector.broadcast %13 : vector<1x16xf32> to vector<8x16xf32>
    %15 = arith.addf %11, %14 : vector<8x16xf32>
    %c0_15 = arith.constant 0 : index
    %c0_16 = arith.constant 0 : index
    %c0_17 = arith.constant 0 : index
    %16 = vector.load %arg7[%c0_15, %c0_16, %c0_17] : memref<1x32x16xf32, #tpu.memory_space<vmem>>, vector<1x32x16xf32>
    %17 = vector.shape_cast %16 : vector<1x32x16xf32> to vector<32x16xf32>
    %cst_18 = arith.constant dense<0.000000e+00> : vector<8x16xf32>
    %18 = tpu.matmul %1, %17, %cst_18 {dimension_numbers = #tpu.dot_dimension_numbers<[1], [0], [0], [1], [0, 0, 1, 1], [], []>} : vector<8x32xf32>, vector<32x16xf32>, vector<8x16xf32> -> vector<8x16xf32>
    %c0_19 = arith.constant 0 : index
    %c0_20 = arith.constant 0 : index
    %c0_21 = arith.constant 0 : index
    %19 = vector.load %arg8[%c0_19, %c0_20, %c0_21] : memref<1x1x16xf32, #tpu.memory_space<vmem>>, vector<1x1x16xf32>
    %20 = vector.shape_cast %19 : vector<1x1x16xf32> to vector<1x16xf32>
    %21 = vector.broadcast %20 : vector<1x16xf32> to vector<8x16xf32>
    %22 = arith.addf %18, %21 : vector<8x16xf32>
    %c0_22 = arith.constant 0 : index
    %c0_23 = arith.constant 0 : index
    %c0_24 = arith.constant 0 : index
    %c0_25 = arith.constant 0 : index
    %23 = vector.load %arg9[%c0_22, %c0_23, %c0_24, %c0_25] : memref<1x1x8x16xf32, #tpu.memory_space<vmem>>, vector<1x1x8x16xf32>
    %24 = vector.shape_cast %23 : vector<1x1x8x16xf32> to vector<8x16xf32>
    %25 = vector.shape_cast %8 : vector<8x16xf32> to vector<1x1x8x16xf32>
    tpu.vector_store %arg9[%c0_22, %c0_23, %c0_24, %c0_25], %25 {strides = array<i32>} : memref<1x1x8x16xf32, #tpu.memory_space<vmem>>, vector<1x1x8x16xf32>,
    %c0_26 = arith.constant 0 : index
    %c0_27 = arith.constant 0 : index
    %c0_28 = arith.constant 0 : index
    %c0_29 = arith.constant 0 : index
    %26 = vector.load %arg10[%c0_26, %c0_27, %c0_28, %c0_29] : memref<1x1x8x16xf32, #tpu.memory_space<vmem>>, vector<1x1x8x16xf32>
    %27 = vector.shape_cast %26 : vector<1x1x8x16xf32> to vector<8x16xf32>
    %28 = vector.shape_cast %15 : vector<8x16xf32> to vector<1x1x8x16xf32>
    tpu.vector_store %arg10[%c0_26, %c0_27, %c0_28, %c0_29], %28 {strides = array<i32>} : memref<1x1x8x16xf32, #tpu.memory_space<vmem>>, vector<1x1x8x16xf32>,
    %c0_30 = arith.constant 0 : index
    %c0_31 = arith.constant 0 : index
    %c0_32 = arith.constant 0 : index
    %c0_33 = arith.constant 0 : index
    %29 = vector.load %arg11[%c0_30, %c0_31, %c0_32, %c0_33] : memref<1x1x8x16xf32, #tpu.memory_space<vmem>>, vector<1x1x8x16xf32>
    %30 = vector.shape_cast %29 : vector<1x1x8x16xf32> to vector<8x16xf32>
    %31 = vector.shape_cast %22 : vector<8x16xf32> to vector<1x1x8x16xf32>
    tpu.vector_store %arg11[%c0_30, %c0_31, %c0_32, %c0_33], %31 {strides = array<i32>} : memref<1x1x8x16xf32, #tpu.memory_space<vmem>>, vector<1x1x8x16xf32>,
    return
  }
  func.func @transform_0(%arg0: i32, %arg1: i32) -> (i32, i32, i32) {
    %c0_i32 = arith.constant 0 : i32
    %c0_i32_0 = arith.constant 0 : i32
    %c0_i32_1 = arith.constant 0 : i32
    return %arg0, %c0_i32, %c0_i32_0 : i32, i32, i32
  }
  func.func @transform_1(%arg0: i32, %arg1: i32) -> (i32, i32, i32) {
    %c0_i32 = arith.constant 0 : i32
    %c0_i32_0 = arith.constant 0 : i32
    %c0_i32_1 = arith.constant 0 : i32
    return %arg1, %c0_i32, %c0_i32_0 : i32, i32, i32
  }
  func.func @transform_2(%arg0: i32, %arg1: i32) -> (i32, i32, i32) {
    %c0_i32 = arith.constant 0 : i32
    %c0_i32_0 = arith.constant 0 : i32
    %c0_i32_1 = arith.constant 0 : i32
    return %arg1, %c0_i32, %c0_i32_0 : i32, i32, i32
  }
  func.func @transform_3(%arg0: i32, %arg1: i32) -> (i32, i32, i32) {
    %c0_i32 = arith.constant 0 : i32
    %c0_i32_0 = arith.constant 0 : i32
    %c0_i32_1 = arith.constant 0 : i32
    return %arg1, %c0_i32, %c0_i32_0 : i32, i32, i32
  }
  func.func @transform_4(%arg0: i32, %arg1: i32) -> (i32, i32, i32) {
    %c0_i32 = arith.constant 0 : i32
    %c0_i32_0 = arith.constant 0 : i32
    %c0_i32_1 = arith.constant 0 : i32
    return %arg1, %c0_i32, %c0_i32_0 : i32, i32, i32
  }
  func.func @transform_5(%arg0: i32, %arg1: i32) -> (i32, i32, i32) {
    %c0_i32 = arith.constant 0 : i32
    %c0_i32_0 = arith.constant 0 : i32
    %c0_i32_1 = arith.constant 0 : i32
    return %arg1, %c0_i32, %c0_i32_0 : i32, i32, i32
  }
  func.func @transform_6(%arg0: i32, %arg1: i32) -> (i32, i32, i32) {
    %c0_i32 = arith.constant 0 : i32
    %c0_i32_0 = arith.constant 0 : i32
    %c0_i32_1 = arith.constant 0 : i32
    return %arg1, %c0_i32, %c0_i32_0 : i32, i32, i32
  }
  func.func @transform_7(%arg0: i32, %arg1: i32) -> (i32, i32, i32, i32) {
    %c0_i32 = arith.constant 0 : i32
    %c0_i32_0 = arith.constant 0 : i32
    %c0_i32_1 = arith.constant 0 : i32
    return %arg0, %arg1, %c0_i32, %c0_i32_0 : i32, i32, i32, i32
  }
  func.func @transform_8(%arg0: i32, %arg1: i32) -> (i32, i32, i32, i32) {
    %c0_i32 = arith.constant 0 : i32
    %c0_i32_0 = arith.constant 0 : i32
    %c0_i32_1 = arith.constant 0 : i32
    return %arg0, %arg1, %c0_i32, %c0_i32_0 : i32, i32, i32, i32
  }
  func.func @transform_9(%arg0: i32, %arg1: i32) -> (i32, i32, i32, i32) {
    %c0_i32 = arith.constant 0 : i32
    %c0_i32_0 = arith.constant 0 : i32
    %c0_i32_1 = arith.constant 0 : i32
    return %arg0, %arg1, %c0_i32, %c0_i32_0 : i32, i32, i32, i32
  }
}

</mosaic_0001>

<bundles_post_ra>
// kernel: tpu_custom_call.1
= control target key start
LH: loop header
LB: loop body
LE: loop exit
PB: predicated region body
PF: predicated region fallthrough
CT: control target
= control target key end

     0   :  { %s1618_s0 = inlined_call_operand.vmem [shape: f32[2,8,32], index: 0, kind: input, shape index: {}]   ;;  %s1619_s1 = inlined_call_operand.vmem [shape: f32[4,32,16], index: 1, kind: input, shape index: {}]   ;;  %s1620_s2 = inlined_call_operand.vmem [shape: f32[4,1,16], index: 2, kind: input, shape index: {}]   ;;  %s1621_s3 = inlined_call_operand.vmem [shape: f32[4,32,16], index: 3, kind: input, shape index: {}]   ;;  %s1622_s4 = inlined_call_operand.vmem [shape: f32[4,1,16], index: 4, kind: input, shape index: {}]   ;;  %s1623_s5 = inlined_call_operand.vmem [shape: f32[4,32,16], index: 5, kind: input, shape index: {}]   ;;  %s1624_s6 = inlined_call_operand.vmem [shape: f32[4,1,16], index: 6, kind: input, shape index: {}]   ;;  %s1625_s7 = inlined_call_operand.hbm [shape: f32[2,4,8,16], index: 7, kind: output, shape index: {0}]   ;;  %s1626_s8 = inlined_call_operand.hbm [shape: f32[2,4,8,16], index: 8, kind: output, shape index: {1}]   ;;  %s1627_s9 = inlined_call_operand.hbm [shape: f32[2,4,8,16], index: 9, kind: output, shape index: {2}]  }
   0x1   :  { %1634 = sst [smem:[#allocation14_spill]] %s1618_s0 }
   0x2   :  { %1635 = sst [smem:[#allocation15_spill]] %s1619_s1 }
   0x3   :  { %1636 = sst [smem:[#allocation16_spill]] %s1620_s2 }
   0x4   :  { %1637 = sst [smem:[#allocation17_spill]] %s1621_s3 }
   0x5   :  { %15 = vsyncpa [#allocation3], 0 }
   0x6   :  { %17 = vsyncpa [#allocation3 + $0x1], 0 }
   0x7   :  { %18 = vsyncpa [#allocation5], 0 }
   0x8   :  { %20 = vsyncpa [#allocation5 + $0x1], 0  ;;  %s1371_s30 = smov 0   ;;  %s1373_s10 = smov 0  }
   0x9   :  { %s1375_s11 = smov 0   ;;  %s1377_s12 = smov 0  }
   0xa   :  { %s1379_s13 = smov 0   ;;  %s1381_s14 = smov 0  }
   0xb   :  { %s1383_s15 = smov 0   ;;  %s1385_s16 = smov 0  }
   0xc LB: > { %1638 = sst [smem:[#allocation9_spill]] %s1305_s14  ;;  %s1629_s17 = sadd.s32 4294967295, %s1313_s16   ;;  %s1313_s16 = sphi %s1385_s16, %s26_s16   ;;  %s1309_s15 = sphi %s1383_s15, %s1655_s15   ;;  %s1305_s14 = sphi %s1381_s14, %s1654_s14   ;;  %s1301_s13 = sphi %s1379_s13, %s1653_s13   ;;  %s1297_s12 = sphi %s1377_s12, %s1652_s12   ;;  %s1293_s11 = sphi %s1375_s11, %s1658_s11   ;;  %s1289_s10 = sphi %s1373_s10, %s1657_s10   ;;  %s1285_s30 = sphi %s1371_s30, %s1656_s30  }
   0xd   : > { %1639 = sst [smem:[#allocation10_spill]] %s1309_s15  ;;  %s1628_s18 = sadd.s32 4294967294, %s1313_s16  }
   0xe   : > { %s35_s19 = sadd.s32 1, %s1305_s14  ;;  %s38_s20 = sadd.s32 1, %s1309_s15 }
   0xf   : > { %p36_p0 = scmp.ge.s32.totalorder %s35_s19, 4  ;;  %p239_p1 = scmp.ne.s32.totalorder %s1293_s11, %s1289_s10 }
  0x10   : > { %p240_p2 = scmp.eq.s32.totalorder %s1629_s17, 7  ;;  %p245_p5 = scmp.ne.s32.totalorder %s1289_s10, %s1285_s30 }
  0x11   : > { %s1660_s19 = smov (%p36_p0, %s35_s19), 0  ;;  %s1662_s20 = smov (!%p36_p0, %s38_s20), %s1309_s15 }
  0x12   : > { %1640 = sst [smem:[#allocation11_spill]] %s1660_s19  ;;  %s225_s21 = ssub.s32 %s1305_s14, %s1660_s19 }
  0x13   : > { %p1424_p3 = por %p240_p2, %p239_p1  ;;  %p40_p4 = scmp.ge.s32.totalorder %s1662_s20, 2 }
  0x14   : > { %p246_p6 = scmp.eq.s32.totalorder %s1628_s18, 7  ;;  %p978_p7 = scmp.ge.s32.totalorder %s1313_s16, 1 }
  0x15   : > { %s1664_s20 = smov (%p40_p4, %s1662_s20), 0  ;;  %p369_p9 = scmp.lt.s32.totalorder %s1313_s16, 9 }
  0x16   : > { %1642 = sst [smem:[#allocation12_spill]] %s1664_s20  ;;  %p1435_p8 = por %p246_p6, %p245_p5 }
  0x17   : > { %s224_s24 = ssub.s32 %s1309_s15, %s1664_s20  ;;  %s229_s25 = sadd.s32 1, %s1293_s11 }
  0x18   : > { %s226_s26 = sor.u32 %s225_s21, %s224_s24  ;;  %p370_p10 = pnand %p978_p7, %p369_p9 }
  0x19   : > { %p227_p11 = scmp.eq.s32.totalorder %s226_s26, 0  ;;  %p442_p12 = scmp.lt.s32.totalorder (!%p370_p10), %s1297_s12, 3  ;;  %v1315_v0 = vmov (!%p370_p10), 0.0|0.0   ;;  %vm1316_vm0 = vmmov (!%p370_p10), 0   ;;  %v1317_v1 = vmov (!%p370_p10), 0.0   ;;  %vm478_vm1 = vcmask (!%p370_p10), 261120  }
  0x1a   : > { %373 = sbr.rel (%p370_p10) target bundleno = 323 (0x143), region = 48  ;;  %p438_p13 = scmp.lt.s32.totalorder (!%p370_p10), %s1301_s13, 1  ;;  %1057 = vmatprep.subr.bf16.mxu0 (!%p370_p10), %v1315_v0  ;;  %1063 = vmatprep.subr.bf16.mxu1 (!%p370_p10), %v1315_v0  ;;  %vm714_vm2 = vcmask (!%p370_p10), 130048  }
  0x1b   : > { %s1444_s27 = scalar_select %p227_p11, %s1293_s11, %s229_s25  }
  0x1c   : > { %1032 = vmatprep.mubr.msk.f32.mxu0 (!%p370_p10), %vm1316_vm0, %v1317_v1  ;;  %1043 = vmatprep.mubr.msk.f32.mxu1 (!%p370_p10), %vm1316_vm0, %v1317_v1  ;;  %s1645_s1 = sld [smem:[#allocation15_spill]] (!%p370_p10)  ;;  %s1646_s3 = sld [smem:[#allocation17_spill]] (!%p370_p10) }
  0x1d   : > { %1644 = sst [smem:[#allocation13_spill]] %s1444_s27  ;;  %s421_s15 = sand.u32 (!%p370_p10), 1, %s1289_s10  }
  0x1e   : > { %s1647_s0 = sld [smem:[#allocation14_spill]] (!%p370_p10)  ;;  %s998_s18 = sshll.u32 (!%p370_p10), %s1301_s13, 2 }
  0x1f   : > { %s1470_s19 = sshll.u32 (!%p370_p10), %s421_s15, 3  ;;  %s1648_s2 = sld [smem:[#allocation16_spill]] (!%p370_p10) }
  0x20   : > { %s1649_s25 = sadd.s32 (!%p370_p10), 4294967295, %s1313_s16  }
  0x21   : > { %s1449_s28 = scalar_select %p442_p12, %s1297_s12, 3 }
  0x22   : > { %s439_s29 = scalar_select %p438_p13, %s1301_s13, 1 }
  0x23   : > { %s1006_s21 = sshll.u32 %s1449_s28, 5  ;;  %s457_s24 = scalar_lea.vmem %s1622_s4, %s1449_s28 }
  0x24   : > { %s446_s26 = scalar_lea.vmem %s1645_s1, %s1006_s21  ;;  %s454_s20 = scalar_lea.vmem %s1646_s3, %s1006_s21  ;;  %v991_v22 = vld [vmem:[%s457_s24] ss:$0 sm:$0xff] }
  0x25   : > { %v467_v2 = vld [vmem:[%s446_s26] sm:$0xff]  ;;  %v468_v3 = vld [vmem:[%s446_s26 + $0x8] sm:$0xff]  ;;  %v469_v4 = vld [vmem:[%s446_s26 + $0x10] sm:$0xff]  ;;  %s462_s14 = scalar_lea.vmem %s1623_s5, %s1006_s21  ;;  %s982_s27 = sshll.u32 %s439_s29, 3 }
  0x26   : > { %v1058_v5 = vpack.c.bf16 %v468_v3, %v467_v2  ;;  %v470_v6 = vld [vmem:[%s446_s26 + $0x18] sm:$0xff]  ;;  %v552_v7 = vld [vmem:[%s454_s20] sm:$0xff]  ;;  %v553_v8 = vld [vmem:[%s454_s20 + $0x8] sm:$0xff]  ;;  %s441_s17 = scalar_lea.vmem %s1647_s0, %s982_s27  ;;  %s449_s29 = scalar_lea.vmem %s1648_s2, %s1449_s28 }
  0x27   : > { %v1064_v9 = vpack.c.bf16 %v553_v8, %v552_v7  ;;  %v1061_v10 = vpack.c.bf16 %v470_v6, %v469_v4  ;;  %v554_v11 = vld [vmem:[%s454_s20 + $0x10] sm:$0xff]  ;;  %v555_v12 = vld [vmem:[%s454_s20 + $0x18] sm:$0xff]  ;;  %v633_v13 = vld [vmem:[%s462_s14] sm:$0xff]  ;;  %s423_s13 = scalar_lea.vmem [#allocation2], %s1470_s19  ;;  %s430_s20 = scalar_lea.vmem [#allocation4], %s1470_s19 }
  0x28   : > { %1059 = vmatpush3.bf16.msra.mxu0 %v1058_v5  ;;  %v634_v14 = vld [vmem:[%s462_s14 + $0x8] sm:$0xff]  ;;  %v1067_v15 = vpack.c.bf16 %v555_v12, %v554_v11  ;;  %v466_v16 = vld [vmem:[%s441_s17] sm:$0xff]  ;;  %v635_v18 = vld [vmem:[%s462_s14 + $0x10] sm:$0xff]  ;;  %s1483_s17 = sand.u32 1, %s1649_s25   ;;  %s744_s1 = sshll.u32 %s423_s13, 4  ;;  %s1495_s1 = int_to_ptr.vmem [resolvable:$true] %s744_s1 }
  0x29   : > { %1060 = vmatprep.subr.bf16.mxu0 %v1315_v0  ;;  %1065 = vmatpush3.bf16.msra.mxu1 %v1064_v9  ;;  %v1070_v17 = vpack.c.bf16 %v634_v14, %v633_v13  ;;  %v636_v19 = vld [vmem:[%s462_s14 + $0x18] sm:$0xff]  ;;  %s740_s14 = sadd.s32 %s1297_s12, %s998_s18  ;;  %v989_v21 = vld [vmem:[%s449_s29] ss:$0 sm:$0xff]  ;;  %s759_s27 = sshll.u32 %s430_s20, 4  ;;  %s1503_s27 = int_to_ptr.vmem [resolvable:$true] %s759_s27 }
  0x2a   : > { %1066 = vmatprep.subr.bf16.mxu1 %v1315_v0  ;;  %v1073_v20 = vpack.c.bf16 %v636_v19, %v635_v18  ;;  %s1485_s0 = sshll.u32 %s740_s14, 7  ;;  %s465_s12 = scalar_lea.vmem %s1624_s6, %s1449_s28 }
  0x2b   : > { %s1493_s29 = scalar_lea.hbm %s1625_s7, %s1485_s0  ;;  %s1501_s26 = scalar_lea.hbm %s1626_s8, %s1485_s0 }
  0x2c   : > { %1062 = vmatpush3.bf16.msra.mxu0 %v1061_v10  ;;  %s719_s18 = scalar_lea.sflag [#allocation3], %s421_s15  ;;  %s1159_s2 = scalar_lea.vmem %s1495_s1, 128 }
  0x2d   : > { %1069 = vmatprep.subr.bf16.mxu0 %v1315_v0  ;;  %1068 = vmatpush3.bf16.msra.mxu1 %v1067_v15  ;;  %p1160_p0 = scmp.ne.s32.totalorder %s1495_s1, %s1159_s2  ;;  %s1318_s3 = smov [#allocation2]  }
  0x2e   : > { %s1163_s14 = sshll.u32 %s1318_s3, 4  ;;  %s1164_s14 = int_to_ptr.vmem [resolvable:$false] %s1163_s14 }
  0x2f   : > { %1033 = vmatmul.mubr.msk.f32.vlgmr.msra.gmra.mrb[0].mxu0 %vm478_vm1, %v466_v16  ;;  %p1161_p1 = pnand %p1160_p0, %p1424_p3  ;;  %s1165_s21 = scalar_lea.vmem %s1164_s14, 256 }
  0x30   : > { %1071 = vmatpush3.bf16.msra.mxu0 %v1070_v17  ;;  %1044 = vmatmul.mubr.msk.f32.vlgmr.msra.gmra.mrb[0].mxu1 %vm478_vm1, %v466_v16  ;;  %p1166_p4 = scmp.lt.s32.totalorder %s1495_s1, %s1164_s14  ;;  %p1167_p5 = scmp.lt.s32.totalorder %s1165_s21, %s1159_s2 }
  0x31   : > { %1072 = vmatprep.subr.bf16.mxu0 %v1315_v0  ;;  %1054 = vmatprep.mubr.msk.f32.mxu0 %vm1316_vm0, %v1317_v1  ;;  %p1162_p2 = pneg %p1161_p1 }
  0x32   : > { %p1168_p6 = por %p1167_p5, %p1166_p4 }
  0x34   : > { %1074 = vmatpush3.bf16.msra.mxu0 %v1073_v20  ;;  %p1169_p7 = pnand %p1168_p6, %p1162_p2 }
  0x37   : > { %1055 = vmatmul.mubr.msk.f32.vlgmr.msra.gmra.mrb[2].mxu0 %vm478_vm1, %v466_v16 }
 0x102   : > { %v548_v23 = vpop.f32.mrb[0].mxu0 }
 0x103   : > { %v549_v24 = vadd.f32 %v989_v21, %v548_v23  ;;  %v1034_v25 = vpop.f32.mrb[1].mxu0  ;;  %v629_v26 = vpop.f32.mrb[0].mxu1 }
 0x104   : > { %v630_v27 = vadd.f32 %v991_v22, %v629_v26  ;;  %v1045_v28 = vpop.f32.mrb[1].mxu1 }
 0x105   : > { %715 = vst.msk [vmem:[%s423_s13] sm:$0xff] %vm714_vm2, %v549_v24 }
 0x106   : > { %716 = vst.msk [vmem:[%s430_s20] sm:$0xff] %vm714_vm2, %v630_v27 }
 0x107   : > { %1172 = shalt.err (!%p1169_p7)
}
 0x108   : > { %s1173_s15 = scalar_lea.hbm %s1493_s29, 128  ;;  %s1177_s3 = scalar_lea.hbm %s1625_s7, 1024 }
 0x109   : > { %p1174_p9 = scmp.ne.s32.totalorder %s1493_s29, %s1173_s15  ;;  %p1178_p12 = scmp.lt.u32.totalorder %s1493_s29, %s1625_s7 }
 0x10a   : > { %p1179_p13 = scmp.lt.u32.totalorder %s1177_s3, %s1173_s15  ;;  %p1181_p1 = scmp.lt.u32.totalorder %s1173_s15, %s1493_s29 }
 0x10b   : > { %p1175_p10 = pnand %p1174_p9, %p1424_p3 }
 0x10c   : > { %p1180_p0 = por %p1179_p13, %p1178_p12 }
 0x10d   : > { %p1176_p11 = pneg %p1175_p10 }
 0x10e   : > { %p1182_p2 = por %p1181_p1, %p1180_p0 }
 0x110   : > { %p1183_p4 = pnand %p1182_p2, %p1176_p11 }
 0x112   : > { %1186 = shalt.err (!%p1183_p4)
}
 0x113   : > { %1075 = dma.vmem_to_hbm [thread:$0]  (%p1424_p3), %s1495_s1, 128, %s1493_s29, %s719_s18  }
 0x114   : > { %s724_s2 = scalar_lea.sflag [#allocation5], %s1483_s17  ;;  %s1187_s14 = scalar_lea.vmem %s1503_s27, 128 }
 0x115   : > { %p1188_p5 = scmp.ne.s32.totalorder %s1503_s27, %s1187_s14  ;;  %s1319_s21 = smov [#allocation4]  }
 0x116   : > { %s1191_s15 = sshll.u32 %s1319_s21, 4  ;;  %s1192_s15 = int_to_ptr.vmem [resolvable:$false] %s1191_s15 }
 0x117   : > { %p1189_p6 = pnand %p1188_p5, %p1424_p3  ;;  %s1193_s13 = scalar_lea.vmem %s1192_s15, 256 }
 0x118   : > { %p1194_p9 = scmp.lt.s32.totalorder %s1503_s27, %s1192_s15  ;;  %p1195_p10 = scmp.lt.s32.totalorder %s1193_s13, %s1187_s14 }
 0x119   : > { %p1190_p7 = pneg %p1189_p6 }
 0x11a   : > { %p1196_p11 = por %p1195_p10, %p1194_p9 }
 0x11c   : > { %p1197_p12 = pnand %p1196_p11, %p1190_p7 }
 0x11e   : > { %1200 = shalt.err (!%p1197_p12)
}
 0x11f   : > { %s1201_s1 = scalar_lea.hbm %s1501_s26, 128  ;;  %s1205_s20 = scalar_lea.hbm %s1626_s8, 1024 }
 0x120   : > { %p1202_p13 = scmp.ne.s32.totalorder %s1501_s26, %s1201_s1  ;;  %p1206_p2 = scmp.lt.u32.totalorder %s1501_s26, %s1626_s8 }
 0x121   : > { %p1207_p4 = scmp.lt.u32.totalorder %s1205_s20, %s1201_s1  ;;  %p1209_p6 = scmp.lt.u32.totalorder %s1201_s1, %s1501_s26 }
 0x122   : > { %p1203_p0 = pnand %p1202_p13, %p1424_p3 }
 0x123   : > { %p1208_p5 = por %p1207_p4, %p1206_p2 }
 0x124   : > { %p1204_p1 = pneg %p1203_p0 }
 0x125   : > { %p1210_p7 = por %p1209_p6, %p1208_p5 }
 0x127   : > { %p1211_p9 = pnand %p1210_p7, %p1204_p1 }
 0x129   : > { %1214 = shalt.err (!%p1211_p9)
}
 0x12a   : > { %1076 = dma.vmem_to_hbm [thread:$0]  (%p1424_p3), %s1503_s27, 128, %s1501_s26, %s724_s2   ;;  %v993_v29 = vld [vmem:[%s465_s12] ss:$0 sm:$0xff]  ;;  %v710_v30 = vpop.f32.mrb[2].mxu0 }
 0x12b   : > { %s437_s21 = scalar_lea.vmem [#allocation6], %s1470_s19  ;;  %v711_v31 = vadd.f32 %v993_v29, %v710_v30  ;;  %v1056_v32 = vpop.f32.mrb[3].mxu0  ;;  %s1566_s29 = scalar_lea.hbm %s1627_s9, %s1485_s0 }
 0x12c   : > { %s774_s15 = sshll.u32 %s437_s21, 4  ;;  %s1320_s28 = smov [#allocation6]   ;;  %s775_s15 = int_to_ptr.vmem [resolvable:$true] %s774_s15 }
 0x12d   : > { %717 = vst.msk [vmem:[%s437_s21] sm:$0xff] %vm714_vm2, %v711_v31  ;;  %s1215_s18 = scalar_lea.vmem %s775_s15, 128  ;;  %s1219_s27 = sshll.u32 %s1320_s28, 4  ;;  %s1220_s27 = int_to_ptr.vmem [resolvable:$false] %s1219_s27 }
 0x12e   : > { %p1216_p10 = scmp.ne.s32.totalorder %s775_s15, %s1215_s18  ;;  %s1221_s19 = scalar_lea.vmem %s1220_s27, 256 }
 0x12f   : > { %p1222_p13 = scmp.lt.s32.totalorder %s775_s15, %s1220_s27  ;;  %p1223_p0 = scmp.lt.s32.totalorder %s1221_s19, %s1215_s18 }
 0x130   : > { %p1217_p11 = pnand %p1216_p10, %p1424_p3 }
 0x131   : > { %p1224_p1 = por %p1223_p0, %p1222_p13 }
 0x132   : > { %p1218_p12 = pneg %p1217_p11 }
 0x134   : > { %p1225_p2 = pnand %p1224_p1, %p1218_p12 }
 0x136   : > { %1228 = shalt.err (!%p1225_p2)
}
 0x137   : > { %s1229_s0 = scalar_lea.hbm %s1566_s29, 128  ;;  %s1233_s20 = scalar_lea.hbm %s1627_s9, 1024 }
 0x138   : > { %p1230_p4 = scmp.ne.s32.totalorder %s1566_s29, %s1229_s0  ;;  %p1234_p7 = scmp.lt.u32.totalorder %s1566_s29, %s1627_s9 }
 0x139   : > { %p1235_p9 = scmp.lt.u32.totalorder %s1233_s20, %s1229_s0  ;;  %p1237_p11 = scmp.lt.u32.totalorder %s1229_s0, %s1566_s29 }
 0x13a   : > { %p1231_p5 = pnand %p1230_p4, %p1424_p3 }
 0x13b   : > { %p1236_p10 = por %p1235_p9, %p1234_p7 }
 0x13c   : > { %p1232_p6 = pneg %p1231_p5 }
 0x13d   : > { %p1238_p12 = por %p1237_p11, %p1236_p10 }
 0x13f   : > { %p1239_p13 = pnand %p1238_p12, %p1232_p6 }
 0x141   : > { %1242 = shalt.err (!%p1239_p13)
}
 0x142   : > { %1077 = dma.vmem_to_hbm [thread:$0]  (%p1424_p3), %s775_s15, 128, %s1566_s29, %s724_s2  }
 0x143 PF: > { %p1091_p0 = scmp.ge.s32.totalorder %s1313_s16, 2  ;;  %s786_s25 = sand.u32 1, %s1285_s30  }
 0x144   : > { %s787_s14 = scalar_lea.sflag [#allocation3], %s786_s25 }
 0x145   : > { %p1082_p1 = pnand %p1091_p0, %p1435_p8 }
 0x147   : > { %1276 = dma.done.wait (!%p1082_p1), %s787_s14, 128  }
 0x148   : > { %1278 = vsyncadd (!%p1082_p1), %s787_s14, 4294967168  ;;  %s1650_s21 = sadd.s32 4294967294, %s1313_s16  }
 0x149   : > { %s795_s13 = sand.u32 1, %s1650_s21  }
 0x14a   : > { %s796_s1 = scalar_lea.sflag [#allocation5], %s795_s13 }
 0x14b   : > { %1280 = dma.done.wait (!%p1082_p1), %s796_s1, 256  }
 0x14c   : > { %1282 = vsyncadd (!%p1082_p1), %s796_s1, 4294967040  ;;  %s26_s16 = sadd.s32 1, %s1313_s16   ;;  %s1651_s22 = sld [smem:[#allocation13_spill]] }
 0x14d   : > { %p23_p3 = scmp.ge.s32.totalorder %s26_s16, 10   ;;  %s1652_s12 = sld [smem:[#allocation9_spill]] }
 0x14e   : > { %s1653_s13 = sld [smem:[#allocation10_spill]]  ;;  %s1654_s14 = sld [smem:[#allocation11_spill]] }
 0x14f   : > { %s1655_s15 = sld [smem:[#allocation12_spill]]  ;;  %s1656_s30 = smov %s1289_s10 }
 0x150   : > { %s1657_s10 = smov %s1293_s11  ;;  %25 = sbr.rel (!%p23_p3) target bundleno = 12 (0xc), region = 133 }
 0x152   : > { %s1658_s11 = smov %s1651_s22 }
 0x157   :  { %810 = vsyncpa [#allocation3], 1 }
 0x158   :  { %812 = vsyncpa [#allocation3 + $0x1], 1 }
 0x159   :  { %813 = vsyncpa [#allocation5], 1 }
 0x15a   :  { %815 = vsyncpa [#allocation5 + $0x1], 1 }

</bundles_post_ra>
